<compile_context>
chip_gen: v5e
topology: v5e:2x2
jax: 0.10.0
libtpu: 0.0.40
codegen_flags: <defaults>
</compile_context>

<pallas_src>
import jax
import jax.numpy as jnp
from jax.experimental import pallas as pl
from jax.experimental.pallas import tpu as pltpu


# ----------------------------- helpers -------------------------------------


def _round_up(x, m):
    return (x + m - 1) // m * m


def _sublane_pack(dtype):
    # rows per packed vreg sublane group: f32 -> 8, bf16 -> 16, int8/fp8 -> 32
    itemsize = jnp.dtype(dtype).itemsize
    return 8 * max(1, 4 // itemsize)


def _fast_recip(x):
    # EUP approximate reciprocal + one Newton-Raphson step (~1e-7 rel error),
    # keeps the divide off the VALU slot.
    r = pl.reciprocal(x, approx=True)
    return r * (2.0 - x * r)


# ----------------------------- kernels -------------------------------------


def _sigmoid_kernel(x_ref, o_ref):
    # f32 compute (required on v5e, harmless elsewhere), cast back on store.
    # sigmoid(x) = 0.5*(tanh(x/2)+1): a single EUP op instead of exp + recip.
    xf = x_ref[...].astype(jnp.float32)
    o_ref[...] = (0.5 * (jnp.tanh(0.5 * xf) + 1.0)).astype(o_ref.dtype)


def _softmax2d_kernel(x_ref, o_ref):
    # Block is (1, C, T) or (1, C, TH, TW); the channel axis is axis=1 in
    # both cases. Max-subtracted softmax in f32. Any garbage read from a
    # ragged (masked) spatial region only produces garbage at spatial
    # positions whose stores are masked -- channel softmax never mixes
    # spatial positions, so real outputs are unaffected.
    x = x_ref[...].astype(jnp.float32)
    m = jnp.max(x, axis=1, keepdims=True)
    e = jnp.exp(x - m)
    s = jnp.sum(e, axis=1, keepdims=True)
    o_ref[...] = (e * _fast_recip(s)).astype(o_ref.dtype)


# ----------------------------- wrappers ------------------------------------

_ELEMWISE_TILE_BYTES = 2 * 1024 * 1024     # per-buffer budget (x4 dbl-buffered in+out)
_SOFTMAX_BUDGET_BYTES = 12 * 1024 * 1024   # total block footprint target (fits v5e 16 MiB)
_SOFTMAX_VMEM_LIMIT = 32 * 1024 * 1024     # safe on v5e/v6e/v7x physical VMEM


def _elementwise_call(kernel, x):
    """Tiled elementwise kernel over a lane-dense 2D view of x (no extra HBM passes)."""
    total = x.size
    itemsize = jnp.dtype(x.dtype).itemsize
    sub = _sublane_pack(x.dtype)

    # Lane width: 1024 when it divides exactly, else 128; only pad for the
    # rare non-128-multiple total (pad is < 128 elements).
    if total % 1024 == 0:
        lane = 1024
    else:
        lane = 128

    rows = pl.cdiv(total, lane)
    padded = rows * lane

    flat = x.reshape(-1)                       # free reshape (contiguous)
    if padded != total:
        flat = jnp.pad(flat, (0, padded - total))
    x2 = flat.reshape(rows, lane)

    # Tile rows by a bytes budget, rounded to the dtype's sublane packing.
    row_tile = max(sub, (_ELEMWISE_TILE_BYTES // (lane * itemsize)) // sub * sub)
    # Keep >=2 grid steps when possible so both v7x TensorCores are fed.
    if rows > sub:
        row_tile = min(row_tile, _round_up(pl.cdiv(rows, 2), sub))
    row_tile = min(row_tile, _round_up(rows, sub))

    out = pl.pallas_call(
        kernel,
        out_shape=jax.ShapeDtypeStruct((rows, lane), x.dtype),
        grid=(pl.cdiv(rows, row_tile),),       # ragged last block is masked on store
        in_specs=[pl.BlockSpec((row_tile, lane), lambda i: (i, 0))],
        out_specs=pl.BlockSpec((row_tile, lane), lambda i: (i, 0)),
        compiler_params=pltpu.CompilerParams(
            dimension_semantics=("parallel",)),
    )(x2)

    out = out.reshape(-1)
    if padded != total:
        out = out[:total]
    return out.reshape(x.shape)


def _softmax2d_call(x):
    """torch.softmax(x, dim=1) for NCHW x, tiled over the spatial extent."""
    n, c, h, w = x.shape
    itemsize = jnp.dtype(x.dtype).itemsize

    # Per-element VMEM footprint of a block: double-buffered input + output
    # (2 * 2 * itemsize) plus in-kernel f32 temporaries (astype + exp ~ 8 B)
    # and slack. Dtype-aware so bf16 inputs neither under-use nor overshoot.
    bytes_per_elem = 4 * itemsize + 12
    max_block_elems = max(1, _SOFTMAX_BUDGET_BYTES // bytes_per_elem)

    if w >= 128:
        # Keep NCHW: the channel reduction runs on a non-minor axis (pure VPU,
        # no XLU sublane reduce, no padding waste for small C).
        th_budget = max_block_elems // (c * w)
        if th_budget >= 8:
            th = max(8, min(_round_up(h, 8), th_budget // 8 * 8))
            # Feed both v7x TensorCores when the batch axis alone can't.
            if n == 1 and h > 8:
                th = max(8, min(th, _round_up(pl.cdiv(h, 2), 8)))
            return pl.pallas_call(
                _softmax2d_kernel,
                out_shape=jax.ShapeDtypeStruct(x.shape, x.dtype),
                grid=(n, pl.cdiv(h, th)),
                in_specs=[pl.BlockSpec((1, c, th, w), lambda b, j: (b, 0, j, 0))],
                out_specs=pl.BlockSpec((1, c, th, w), lambda b, j: (b, 0, j, 0)),
                compiler_params=pltpu.CompilerParams(
                    dimension_semantics=("parallel", "parallel"),
                    vmem_limit_bytes=_SOFTMAX_VMEM_LIMIT),
            )(x)

        # Degenerate large C*W: even (1, C, 8, W) blows the budget. Tile W in
        # 128-multiples too (important on v7x's 64 MiB physical VMEM; don't
        # rely on raising the scoped limit).
        tw = max(128, (max_block_elems // (c * 8)) // 128 * 128)
        tw = min(tw, max(128, (w // 128) * 128))
        return pl.pallas_call(
            _softmax2d_kernel,
            out_shape=jax.ShapeDtypeStruct(x.shape, x.dtype),
            grid=(n, pl.cdiv(h, 8), pl.cdiv(w, tw)),
            in_specs=[pl.BlockSpec((1, c, 8, tw), lambda b, j, k: (b, 0, j, k))],
            out_specs=pl.BlockSpec((1, c, 8, tw), lambda b, j, k: (b, 0, j, k)),
            compiler_params=pltpu.CompilerParams(
                dimension_semantics=("parallel", "parallel", "parallel"),
                vmem_limit_bytes=_SOFTMAX_VMEM_LIMIT),
        )(x)

    # Small W: flatten H*W onto the lane axis (free reshape of a contiguous
    # tensor) and tile it in 128-multiples. No jnp.pad / slice: the ragged
    # last block's stores are masked and spatial positions are independent.
    hw = h * w
    x2 = x.reshape(n, c, hw)

    if hw <= 128:
        t = hw                                  # full extent (satisfies layout rule)
    else:
        t = max(128, (max_block_elems // c) // 128 * 128)
        if n == 1:
            t = max(128, min(t, _round_up(pl.cdiv(hw, 2), 128)))
        t = min(t, (hw // 128) * 128)           # largest 128-multiple <= hw

    out = pl.pallas_call(
        _softmax2d_kernel,
        out_shape=jax.ShapeDtypeStruct((n, c, hw), x.dtype),
        grid=(n, pl.cdiv(hw, t)),
        in_specs=[pl.BlockSpec((1, c, t), lambda b, j: (b, 0, j))],
        out_specs=pl.BlockSpec((1, c, t), lambda b, j: (b, 0, j)),
        compiler_params=pltpu.CompilerParams(
            dimension_semantics=("parallel", "parallel"),
            vmem_limit_bytes=_SOFTMAX_VMEM_LIMIT),
    )(x2)
    return out.reshape(n, c, h, w)


def activation_forward(x, activation):
    """Pallas equivalent of Activation(activation)(x)."""
    if activation is None or activation == "identity":
        # nn.Identity(): no kernel, no HBM round trip.
        return jnp.asarray(x)
    elif activation == "sigmoid":
        return _elementwise_call(_sigmoid_kernel, x)
    elif activation == "softmax2d":
        return _softmax2d_call(x)
    elif callable(activation):
        # TODO(synk): arbitrary user callables cannot be pre-compiled as a fixed Pallas kernel
        return activation(x)
    else:
        raise ValueError(activation)


# ----------------------------- test ----------------------------------------


def _ref_softmax2d(x):
    xf = x.astype(jnp.float32)
    m = jnp.max(xf, axis=1, keepdims=True)
    e = jnp.exp(xf - m)
    return (e / jnp.sum(e, axis=1, keepdims=True)).astype(x.dtype)


if __name__ == "__main__":
    key = jax.random.PRNGKey(0)
    x = jax.random.normal(key, (2, 4, 16, 16), dtype=jnp.float32)

    # identity
    y_id = jax.block_until_ready(activation_forward(x, "identity"))
    assert jnp.allclose(y_id, x)

    # sigmoid (1024-aligned total: lane=1024, no padding)
    y_sig = jax.block_until_ready(activation_forward(x, "sigmoid"))
    assert jnp.allclose(y_sig, jax.nn.sigmoid(x), atol=1e-5)

    # sigmoid on a non-128-multiple total (exercises the tiny pad + ragged block)
    x_odd = jax.random.normal(jax.random.PRNGKey(1), (2, 4, 10, 10), jnp.float32)
    y_sig_odd = jax.block_until_ready(activation_forward(x_odd, "sigmoid"))
    assert jnp.allclose(y_sig_odd, jax.nn.sigmoid(x_odd), atol=1e-5)

    # sigmoid in bf16 (exercises dtype-aware sublane packing)
    x_bf = x.astype(jnp.bfloat16)
    y_bf = jax.block_until_ready(activation_forward(x_bf, "sigmoid"))
    assert jnp.allclose(y_bf.astype(jnp.float32),
                        jax.nn.sigmoid(x).astype(jnp.float32), atol=1e-2)

    # softmax over channel dim (dim=1): small-W flattened path, hw multiple of 128
    y_sm = jax.block_until_ready(activation_forward(x, "softmax2d"))
    assert jnp.allclose(y_sm, _ref_softmax2d(x), atol=1e-5)
    assert jnp.allclose(jnp.sum(y_sm, axis=1), jnp.ones((2, 16, 16)), atol=1e-5)

    # softmax small-W path with hw < 128 (full-extent block, no padding)
    y_odd = jax.block_until_ready(activation_forward(x_odd, "softmax2d"))
    assert jnp.allclose(y_odd, _ref_softmax2d(x_odd), atol=1e-5)

    # softmax small-W path with hw >= 128 but not a multiple (ragged masked block)
    x_rag = jax.random.normal(jax.random.PRNGKey(3), (2, 4, 15, 13), jnp.float32)
    y_rag = jax.block_until_ready(activation_forward(x_rag, "softmax2d"))
    assert jnp.allclose(y_rag, _ref_softmax2d(x_rag), atol=1e-5)

    # softmax wide-W path (W >= 128): NCHW blocks, channel reduce on VPU
    x_wide = jax.random.normal(jax.random.PRNGKey(2), (1, 3, 8, 128), jnp.float32)
    y_wide = jax.block_until_ready(activation_forward(x_wide, "softmax2d"))
    assert jnp.allclose(y_wide, _ref_softmax2d(x_wide), atol=1e-5)

    # softmax wide-W path with non-multiple-of-8 H (ragged masked H block)
    x_wh = jax.random.normal(jax.random.PRNGKey(4), (1, 3, 11, 128), jnp.float32)
    y_wh = jax.block_until_ready(activation_forward(x_wh, "softmax2d"))
    assert jnp.allclose(y_wh, _ref_softmax2d(x_wh), atol=1e-5)

    print("KERNEL_OK")
</pallas_src>

<mosaic_0001>
module attributes {stable_mosaic.version = 11 : i64} {
  func.func @_sigmoid_kernel(%arg0: i32, %arg1: memref<8x1024xf32, #tpu.memory_space<vmem>>, %arg2: memref<8x1024xf32, #tpu.memory_space<vmem>>) attributes {dimension_semantics = [#tpu.dimension_semantics<parallel>], iteration_bounds = array<i64: 1>, scalar_prefetch = 0 : i64, scratch_operands = 0 : i64, tpu.core_type = #tpu.core_type<tc>, window_params = [{transform_indices = @transform_0, window_bounds = array<i64: 8, 1024>}, {transform_indices = @transform_1, window_bounds = array<i64: 8, 1024>}]} {
    %c0 = arith.constant 0 : index
    %c0_0 = arith.constant 0 : index
    %0 = vector.load %arg1[%c0, %c0_0] : memref<8x1024xf32, #tpu.memory_space<vmem>>, vector<8x1024xf32>
    %cst = arith.constant 5.000000e-01 : f32
    %1 = vector.broadcast %cst : f32 to vector<8x1024xf32>
    %2 = arith.mulf %1, %0 : vector<8x1024xf32>
    %3 = math.tanh %2 : vector<8x1024xf32>
    %cst_1 = arith.constant 1.000000e+00 : f32
    %4 = vector.broadcast %cst_1 : f32 to vector<8x1024xf32>
    %5 = arith.addf %3, %4 : vector<8x1024xf32>
    %cst_2 = arith.constant 5.000000e-01 : f32
    %6 = vector.broadcast %cst_2 : f32 to vector<8x1024xf32>
    %7 = arith.mulf %6, %5 : vector<8x1024xf32>
    %c0_3 = arith.constant 0 : index
    %c0_4 = arith.constant 0 : index
    %8 = vector.load %arg2[%c0_3, %c0_4] : memref<8x1024xf32, #tpu.memory_space<vmem>>, vector<8x1024xf32>
    tpu.vector_store %arg2[%c0_3, %c0_4], %7 {strides = array<i32>} : memref<8x1024xf32, #tpu.memory_space<vmem>>, vector<8x1024xf32>,
    return
  }
  func.func @transform_0(%arg0: i32) -> (i32, i32) {
    %c0_i32 = arith.constant 0 : i32
    %c0_i32_0 = arith.constant 0 : i32
    return %arg0, %c0_i32 : i32, i32
  }
  func.func @transform_1(%arg0: i32) -> (i32, i32) {
    %c0_i32 = arith.constant 0 : i32
    %c0_i32_0 = arith.constant 0 : i32
    return %arg0, %c0_i32 : i32, i32
  }
}

</mosaic_0001>

<bundles_post_ra>
// kernel: tpu_custom_call.1
= control target key start
LH: loop header
LB: loop body
LE: loop exit
PB: predicated region body
PF: predicated region fallthrough
CT: control target
= control target key end

     0   :  { %6 = vsyncpa [#allocation3], 0  ;;  %s190_s0 = inlined_call_operand.hbm [shape: f32[2,1024], index: 0, kind: input, shape index: {}]   ;;  %s191_s1 = inlined_call_operand.hbm [shape: f32[2,1024], index: 1, kind: output, shape index: {}]  }
   0x1   :  { %7 = vsyncpa [#allocation4], 0 }
   0x2   :  { %11 = vsyncadd [#allocation3], 768  ;;  %s12_s8 = sshll.u32 %s190_s0, 4  ;;  %s164_s9 = smov [#allocation2]   ;;  %s13_s8 = int_to_ptr.hbm [resolvable:$true] %s12_s8 }
   0x3   :  { %s14_s10 = sshll.u32 %s164_s9, 4  ;;  %s165_s11 = smov 256   ;;  %s15_s10 = int_to_ptr.vmem [resolvable:$true] %s14_s10 }
   0x4   :  { %s166_s12 = smov 16  }
   0x5   :  { %20 = dma.hbm_to_vmem [thread:$0]  %s13_s8, 256, %s15_s10, [#allocation3], %s165_s11, %s165_s11, %s166_s12  }
   0x6   :  { %160 = dma.done.wait [#allocation3], 1024  }
   0x7   :  { %161 = vsyncadd [#allocation3], 4294966272  ;;  %v25_v0 = vld [vmem:[#allocation2] sm:$0xff]  ;;  %v26_v1 = vld [vmem:[#allocation2 + $0x8] sm:$0xff] }
   0x8   :  { %v27_v2 = vld [vmem:[#allocation2 + $0x10] sm:$0xff]  ;;  %v33_v3 = vmul.f32 0.5, %v25_v0  ;;  %v34_v4 = vmul.f32 0.5, %v26_v1  ;;  %v28_v6 = vld [vmem:[#allocation2 + $0x18] sm:$0xff]  ;;  %v29_v7 = vld [vmem:[#allocation2 + $0x20] sm:$0xff] }
   0x9   :  { %v35_v5 = vmul.f32 0.5, %v27_v2  ;;  %v30_v8 = vld [vmem:[#allocation2 + $0x28] sm:$0xff]  ;;  %v36_v9 = vmul.f32 0.5, %v28_v6  ;;  %v31_v10 = vld [vmem:[#allocation2 + $0x30] sm:$0xff]  ;;  %v37_v11 = vmul.f32 0.5, %v29_v7  ;;  %v32_v12 = vld [vmem:[#allocation2 + $0x38] sm:$0xff] }
   0xa   :  { %96 = vtanh.f32 %v33_v3  ;;  %v38_v13 = vmul.f32 0.5, %v30_v8  ;;  %v39_v14 = vmul.f32 0.5, %v31_v10  ;;  %v40_v15 = vmul.f32 0.5, %v32_v12 }
   0xb   :  { %98 = vtanh.f32 %v34_v4 }
   0xc   :  { %100 = vtanh.f32 %v35_v5 }
   0xd   :  { %102 = vtanh.f32 %v36_v9 }
   0xe   :  { %104 = vtanh.f32 %v37_v11 }
   0xf   :  { %106 = vtanh.f32 %v38_v13 }
  0x10   :  { %v97_v16 = vpop.eup %96  ;;  %108 = vtanh.f32 %v39_v14 }
  0x11   :  { %v99_v17 = vpop.eup %98  ;;  %v49_v18 = vadd.f32 1.0, %v97_v16  ;;  %110 = vtanh.f32 %v40_v15 }
  0x12   :  { %v101_v19 = vpop.eup %100  ;;  %v50_v20 = vadd.f32 1.0, %v99_v17 }
  0x13   :  { %v103_v21 = vpop.eup %102  ;;  %v57_v22 = vmul.f32 0.5, %v49_v18  ;;  %v51_v23 = vadd.f32 1.0, %v101_v19 }
  0x14   :  { %v105_v24 = vpop.eup %104  ;;  %v58_v25 = vmul.f32 0.5, %v50_v20  ;;  %v52_v26 = vadd.f32 1.0, %v103_v21 }
  0x15   :  { %v107_v27 = vpop.eup %106  ;;  %65 = vst [vmem:[#allocation5] sm:$0xff] %v57_v22  ;;  %v59_v28 = vmul.f32 0.5, %v51_v23  ;;  %v53_v29 = vadd.f32 1.0, %v105_v24 }
  0x16   :  { %v109_v30 = vpop.eup %108  ;;  %66 = vst [vmem:[#allocation5 + $0x8] sm:$0xff] %v58_v25  ;;  %v60_v31 = vmul.f32 0.5, %v52_v26  ;;  %v54_v32 = vadd.f32 1.0, %v107_v27 }
  0x17   :  { %v111_v33 = vpop.eup %110  ;;  %67 = vst [vmem:[#allocation5 + $0x10] sm:$0xff] %v59_v28  ;;  %v61_v34 = vmul.f32 0.5, %v53_v29  ;;  %v55_v35 = vadd.f32 1.0, %v109_v30 }
  0x18   :  { %68 = vst [vmem:[#allocation5 + $0x18] sm:$0xff] %v60_v31  ;;  %v62_v36 = vmul.f32 0.5, %v54_v32  ;;  %v56_v37 = vadd.f32 1.0, %v111_v33 }
  0x19   :  { %69 = vst [vmem:[#allocation5 + $0x20] sm:$0xff] %v61_v34  ;;  %v63_v38 = vmul.f32 0.5, %v55_v35 }
  0x1a   :  { %70 = vst [vmem:[#allocation5 + $0x28] sm:$0xff] %v62_v36  ;;  %v64_v39 = vmul.f32 0.5, %v56_v37 }
  0x1b   :  { %71 = vst [vmem:[#allocation5 + $0x30] sm:$0xff] %v63_v38 }
  0x1c   :  { %72 = vst [vmem:[#allocation5 + $0x38] sm:$0xff] %v64_v39 }
  0x1d   :  { %76 = vsyncadd [#allocation4], 768  ;;  %s79_s14 = sshll.u32 %s191_s1, 4  ;;  %s167_s15 = smov [#allocation5]   ;;  %s80_s14 = int_to_ptr.hbm [resolvable:$true] %s79_s14 }
  0x1e   :  { %s77_s16 = sshll.u32 %s167_s15, 4  ;;  %s78_s16 = int_to_ptr.vmem [resolvable:$true] %s77_s16 }
  0x1f   :  { %85 = dma.vmem_to_hbm [thread:$0]  %s78_s16, 256, %s80_s14, [#allocation4], %s165_s11, %s165_s11, %s166_s12  }
  0x20   :  { %162 = dma.done.wait [#allocation4], 1024  }
  0x21   :  { %163 = vsyncadd [#allocation4], 4294966272 }
  0x22   :  { %90 = vsyncpa [#allocation3], 1 }
  0x23   :  { %91 = vsyncpa [#allocation4], 1 }

</bundles_post_ra>
